<compile_context>
chip_gen: v7x
topology: tpu7x:2x2x1
jax: 0.10.0
libtpu: 0.0.40
codegen_flags: <defaults>
</compile_context>

<pallas_src>
import jax
import jax.numpy as jnp
from jax.experimental import pallas as pl
from jax.experimental.pallas import tpu as pltpu

PAD_ID = 1  # RoBERTa pad token id; mask = input_ids.ne(1) in the PyTorch code

_VMEM = pl.BlockSpec(memory_space=pltpu.MemorySpace.VMEM)


# ---------------------------------------------------------------------------
# Kernel A: masked mean pooling over the sequence axis (gridded + pipelined)
#   outputs = (hidden * mask).sum(1) / mask.sum(1)
# Grid = (batch_blocks, h_blocks, seq_blocks); output block is the accumulator
# (revisited across the seq axis; init / finalize via pl.when).
# ---------------------------------------------------------------------------
def _pool_kernel(ids_ref, hid_ref, out_ref, cnt_ref):
    li = pl.program_id(2)

    @pl.when(li == 0)
    def _init():
        out_ref[...] = jnp.zeros_like(out_ref)
        cnt_ref[...] = jnp.zeros_like(cnt_ref)

    # mask derived in-kernel from the int32 ids block (no f32 mask array in HBM)
    mask_f32 = (ids_ref[...] != PAD_ID).astype(jnp.float32)          # (bb, 1, bl)
    cnt_ref[...] += jnp.sum(mask_f32, axis=2, keepdims=True)         # (bb, 1, 1)

    # Single batched MXU contraction over this sequence block:
    #   (bb, 1, bl) x (bb, bl, hh) -> (bb, 1, hh), f32 accumulation.
    partial = jax.lax.dot_general(
        mask_f32.astype(hid_ref.dtype), hid_ref[...],
        dimension_numbers=(((2,), (1,)), ((0,), (0,))),
        preferred_element_type=jnp.float32)
    out_ref[...] += partial                                          # one whole-block RMW

    @pl.when(li == pl.num_programs(2) - 1)
    def _finalize():
        # Exact division (parity with PyTorch); clamp guards all-padding rows
        # (PyTorch would produce NaN/inf there — intentional deviation).
        out_ref[...] = out_ref[...] / jnp.maximum(cnt_ref[...], 1.0)


def _chip_config():
    """Per-generation tiling budget: (hidden-block budget, vmem_limit, allow_h_split).
    v5e/v6e (128 MiB VMEM): ~12 MiB blocks, 64 MiB scoped limit.
    v7x-class (64 MiB VMEM, 2 TCs): ~8 MiB blocks, 48 MiB limit, allow an
    H-split grid axis so both TensorCores get work at small batch."""
    try:
        vmem = int(pltpu.get_tpu_info().vmem_capacity_bytes)
    except Exception:
        vmem = 0  # unknown -> conservative settings valid on every generation
    if vmem >= 100 * 1024 * 1024:
        return 12 * 1024 * 1024, 64 * 1024 * 1024, False
    if vmem > 0:
        return 8 * 1024 * 1024, 48 * 1024 * 1024, True
    return 8 * 1024 * 1024, 48 * 1024 * 1024, False


def _pool_block_sizes(tb, seq, hidden, itemsize, budget_bytes):
    """Pick (batch_block, seq_block) so the double-buffered bf16 hidden block
    stays around `budget_bytes` (well under the scoped VMEM limit)."""
    bb = tb if tb <= 8 else 8                              # sublane-aligned batch block
    bl = budget_bytes // max(1, bb * hidden * itemsize)
    if bl >= seq:
        return bb, seq
    bl = max(128, (bl // 128) * 128)                       # lane-aligned seq block
    if bl >= seq:
        return bb, seq
    return bb, bl


def masked_mean_pool(input_ids, hidden_states, bb, bl, n_h, vmem_limit):
    tb, seq, h = hidden_states.shape
    hh = h // n_h
    ids3 = input_ids.reshape(tb, 1, seq)                   # metadata-only reshape
    grid = (tb // bb, n_h, seq // bl)

    cost = pl.CostEstimate(
        flops=2 * tb * seq * h,
        transcendentals=0,
        bytes_accessed=(tb * seq * h * hidden_states.dtype.itemsize
                        + tb * seq * input_ids.dtype.itemsize * n_h
                        + tb * h * 4))

    return pl.pallas_call(
        _pool_kernel,
        out_shape=jax.ShapeDtypeStruct((tb, 1, h), jnp.float32),
        grid_spec=pltpu.PrefetchScalarGridSpec(
            num_scalar_prefetch=0,
            grid=grid,
            in_specs=[
                pl.BlockSpec((bb, 1, bl), lambda b, hseg, l: (b, 0, l)),   # int32 ids
                pl.BlockSpec((bb, bl, hh), lambda b, hseg, l: (b, l, hseg)),  # bf16 hidden
            ],
            # Output block revisited across the (last, "arbitrary") seq axis -> accumulator.
            out_specs=pl.BlockSpec((bb, 1, hh), lambda b, hseg, l: (b, 0, hseg)),
            scratch_shapes=[pltpu.VMEM((bb, 1, 1), jnp.float32)],          # token counts
        ),
        compiler_params=pltpu.CompilerParams(
            dimension_semantics=("parallel", "parallel", "arbitrary"),
            vmem_limit_bytes=vmem_limit,
        ),
        cost_estimate=cost,
    )(ids3, hidden_states)


# ---------------------------------------------------------------------------
# Kernel B: classification head + softmax/cross-entropy + pair cosine-sim
#   RobertaClassificationHead: Linear(2H->H) -> tanh -> Linear(H->2)
#   (tiny: M ~ 8; dominated by kernel A, so kept simple / f32)
# ---------------------------------------------------------------------------
def _head_kernel(feat_ref, w1_ref, b1_ref, w2_ref, b2_ref, onehot_ref,
                 probs_ref, loss_ref, cos_ref):
    feat = feat_ref[...]                              # (Bp, 2H), Bp multiple of 8
    h = feat.shape[1] // 2

    # dense -> tanh -> out_proj (MXU matmuls)
    x = jnp.dot(feat, w1_ref[...], preferred_element_type=jnp.float32) + b1_ref[...]
    x = jnp.tanh(x)
    logits = jnp.dot(x, w2_ref[...], preferred_element_type=jnp.float32) + b2_ref[...]

    # F.softmax + cross-entropy.  One-hots are pre-scaled by 1/bs (and zero for
    # batch-padding rows) so the mean CE loss is a plain sum here.
    m = jnp.max(logits, axis=-1, keepdims=True)
    e = jnp.exp(logits - m)
    s = jnp.sum(e, axis=-1, keepdims=True)
    probs_ref[...] = e / s
    log_probs = (logits - m) - jnp.log(s)
    nll = -jnp.sum(onehot_ref[...] * log_probs, axis=-1, keepdims=True)   # (Bp, 1)
    loss_ref[...] = jnp.sum(nll, axis=0, keepdims=True)                   # (1, 1)

    # cosine similarity of the two L2-normalized pooled vectors of each pair
    # (F.normalize eps=1e-12 on the norm  <=>  1e-24 clamp on the squared norm).
    u = feat[:, :h]
    v = feat[:, h:]
    inv_u = jax.lax.rsqrt(jnp.maximum(jnp.sum(u * u, axis=-1, keepdims=True), 1e-24))
    inv_v = jax.lax.rsqrt(jnp.maximum(jnp.sum(v * v, axis=-1, keepdims=True), 1e-24))
    cos_ref[...] = jnp.sum(u * v, axis=-1, keepdims=True) * inv_u * inv_v


def classifier_head(features, w1, b1, w2, b2, onehot):
    bp = features.shape[0]
    return pl.pallas_call(
        _head_kernel,
        out_shape=(jax.ShapeDtypeStruct((bp, 2), jnp.float32),
                   jax.ShapeDtypeStruct((1, 1), jnp.float32),
                   jax.ShapeDtypeStruct((bp, 1), jnp.float32)),
        in_specs=[_VMEM] * 6,
        out_specs=(_VMEM, _VMEM, _VMEM),
    )(features, w1, b1, w2, b2, onehot)


# ---------------------------------------------------------------------------
# Parameters & forward wrapper
# ---------------------------------------------------------------------------
def init_params(key, vocab, hidden):
    k_emb, k_w1, k_b1, k_w2, k_b2 = jax.random.split(key, 5)
    return {
        "emb": 0.02 * jax.random.normal(k_emb, (vocab, hidden), jnp.float32),
        "w1":  0.02 * jax.random.normal(k_w1, (2 * hidden, hidden), jnp.float32),
        "b1":  0.02 * jax.random.normal(k_b1, (1, hidden), jnp.float32),
        "w2":  0.02 * jax.random.normal(k_w2, (hidden, 2), jnp.float32),
        "b2":  0.02 * jax.random.normal(k_b2, (1, 2), jnp.float32),
    }


def pair_model_forward(inputs_ids_1, inputs_ids_2, labels, params, lambd=0.0):
    bs, seq = inputs_ids_1.shape
    hidden = params["emb"].shape[1]

    # torch.cat((ids1.unsqueeze(1), ids2.unsqueeze(1)), 1).view(bs*2, l)
    input_ids = jnp.concatenate(
        [inputs_ids_1[:, None, :], inputs_ids_2[:, None, :]], axis=1
    ).reshape(bs * 2, seq)

    tb = 2 * bs
    budget, vmem_limit, allow_h_split = _chip_config()
    bb, bl = _pool_block_sizes(tb, seq, hidden, itemsize=2, budget_bytes=budget)
    pad_b = (-tb) % bb
    pad_l = (-seq) % bl
    ids_p = input_ids
    if pad_b or pad_l:
        # Pad with PAD_ID: padded positions/rows carry zero mask weight.
        ids_p = jnp.pad(input_ids, ((0, pad_b), (0, pad_l)), constant_values=PAD_ID)

    # On 2-TC parts, if there is only one batch block, split the hidden dim into
    # a second parallel grid axis so both TensorCores get an independent HBM stream.
    n_batch_blocks = (tb + pad_b) // bb
    n_h = 2 if (allow_h_split and n_batch_blocks < 2 and hidden % 256 == 0) else 1

    # TODO(synk): the RoBERTa `encoder` is an injected external module; it is replaced
    # here with a deterministic bf16 embedding lookup producing last_hidden_state.
    # With a real encoder, feed its output directly (in its native dtype, ideally bf16)
    # into masked_mean_pool — kernel A is HBM-bound, so bytes are the whole cost.
    last_hidden_state = params["emb"].astype(jnp.bfloat16)[ids_p]   # (tb+pad, seq+pad, H) bf16

    # masked mean pooling (Pallas kernel A, gridded & pipelined)
    pooled = masked_mean_pool(ids_p, last_hidden_state, bb, bl, n_h, vmem_limit)
    pooled = pooled[:tb, 0, :]                                       # (2*bs, hidden) f32

    # outputs.reshape(-1, 2, H) followed by the head's reshape(-1, 2H) == (bs, 2H)
    features = pooled.reshape(bs, 2 * hidden)

    # Sublane-align the tiny head: pad pair-batch rows to a multiple of 8.
    bp = ((bs + 7) // 8) * 8
    feat_p = jnp.pad(features, ((0, bp - bs), (0, 0)))
    onehot = jax.nn.one_hot(labels, 2, dtype=jnp.float32) / jnp.float32(bs)
    onehot_p = jnp.pad(onehot, ((0, bp - bs), (0, 0)))

    probs_p, loss_c, cos_p = classifier_head(
        feat_p, params["w1"], params["b1"], params["w2"], params["b2"], onehot_p)
    classifier_probs = probs_p[:bs]
    cos_sim = cos_p[:bs, 0]
    loss_classifier = loss_c[0, 0]

    loss_dml = jnp.float32(0.0)
    loss = None
    probs = None
    if lambd != 0.0:
        # TODO(synk): source does `CrossEntropyLoss(cos_sim, labels)` which *constructs* the
        # loss module rather than computing a loss; semantics undefined, not reproduced.
        probs = cos_sim
        loss = loss_dml
    if lambd != 1.0:
        probs = classifier_probs
        loss = loss_classifier
    if lambd == 0.0 or lambd == 1.0:
        return loss, probs
    return loss_dml * lambd + loss_classifier * (1.0 - lambd), probs


if __name__ == "__main__":
    key = jax.random.PRNGKey(0)
    B, L, H, VOCAB = 2, 8, 32, 50   # pairs, seq len, hidden size, vocab

    k_ids1, k_ids2, k_lab, k_par = jax.random.split(key, 4)
    inputs_ids_1 = jax.random.randint(k_ids1, (B, L), 0, VOCAB, dtype=jnp.int32)
    inputs_ids_2 = jax.random.randint(k_ids2, (B, L), 0, VOCAB, dtype=jnp.int32)
    # add some explicit padding (token id 1) at the tail, like real batches
    inputs_ids_1 = inputs_ids_1.at[:, -2:].set(PAD_ID)
    inputs_ids_2 = inputs_ids_2.at[:, -1:].set(PAD_ID)
    labels = jax.random.randint(k_lab, (B,), 0, 2, dtype=jnp.int32)

    params = init_params(k_par, VOCAB, H)

    loss, probs = pair_model_forward(inputs_ids_1, inputs_ids_2, labels, params, lambd=0.0)
    jax.block_until_ready((loss, probs))
    assert probs.shape == (B, 2) and loss.shape == ()
    print("KERNEL_OK")
</pallas_src>

<mosaic_0001>
module attributes {stable_mosaic.version = 11 : i64} {
  func.func @_pool_kernel(%arg0: i32, %arg1: i32, %arg2: i32, %arg3: memref<4x1x8xi32, #tpu.memory_space<vmem>>, %arg4: memref<4x8x32xbf16, #tpu.memory_space<vmem>>, %arg5: memref<4x1x32xf32, #tpu.memory_space<vmem>>, %arg6: memref<4x1x1xf32, #tpu.memory_space<vmem>>) attributes {dimension_semantics = [#tpu.dimension_semantics<parallel>, #tpu.dimension_semantics<parallel>, #tpu.dimension_semantics<arbitrary>], iteration_bounds = array<i64: 1, 1, 1>, scalar_prefetch = 0 : i64, scratch_operands = 1 : i64, tpu.core_type = #tpu.core_type<tc>, window_params = [{transform_indices = @transform_0, window_bounds = array<i64: 4, 1, 8>}, {transform_indices = @transform_1, window_bounds = array<i64: 4, 8, 32>}, {transform_indices = @transform_2, window_bounds = array<i64: 4, 1, 32>}]} {
    %c0_i32 = arith.constant 0 : i32
    %0 = arith.cmpi eq, %arg2, %c0_i32 : i32
    %1 = arith.extui %0 : i1 to i32
    %c0_i32_0 = arith.constant 0 : i32
    %2 = arith.cmpi ne, %1, %c0_i32_0 : i32
    scf.if %2 {
      %cst_21 = arith.constant 0.000000e+00 : f32
      %22 = vector.broadcast %cst_21 : f32 to vector<4x1x32xf32>
      %c0_22 = arith.constant 0 : index
      %c0_23 = arith.constant 0 : index
      %c0_24 = arith.constant 0 : index
      %23 = vector.load %arg5[%c0_22, %c0_23, %c0_24] : memref<4x1x32xf32, #tpu.memory_space<vmem>>, vector<4x1x32xf32>
      tpu.vector_store %arg5[%c0_22, %c0_23, %c0_24], %22 {strides = array<i32>} : memref<4x1x32xf32, #tpu.memory_space<vmem>>, vector<4x1x32xf32>,
      %cst_25 = arith.constant 0.000000e+00 : f32
      %24 = vector.broadcast %cst_25 : f32 to vector<4x1x1xf32>
      %c0_26 = arith.constant 0 : index
      %c0_27 = arith.constant 0 : index
      %c0_28 = arith.constant 0 : index
      %25 = vector.load %arg6[%c0_26, %c0_27, %c0_28] : memref<4x1x1xf32, #tpu.memory_space<vmem>>, vector<4x1x1xf32>
      tpu.vector_store %arg6[%c0_26, %c0_27, %c0_28], %24 {strides = array<i32>} : memref<4x1x1xf32, #tpu.memory_space<vmem>>, vector<4x1x1xf32>,
    } else {
    }
    %c0 = arith.constant 0 : index
    %c0_1 = arith.constant 0 : index
    %c0_2 = arith.constant 0 : index
    %3 = vector.load %arg3[%c0, %c0_1, %c0_2] : memref<4x1x8xi32, #tpu.memory_space<vmem>>, vector<4x1x8xi32>
    %c1_i32 = arith.constant 1 : i32
    %4 = vector.broadcast %c1_i32 : i32 to vector<4x1x8xi32>
    %5 = arith.cmpi ne, %3, %4 : vector<4x1x8xi32>
    %6 = arith.extui %5 : vector<4x1x8xi1> to vector<4x1x8xi32>
    %7 = arith.sitofp %6 : vector<4x1x8xi32> to vector<4x1x8xf32>
    %c0_3 = arith.constant 0 : index
    %c0_4 = arith.constant 0 : index
    %c0_5 = arith.constant 0 : index
    %8 = vector.load %arg6[%c0_3, %c0_4, %c0_5] : memref<4x1x1xf32, #tpu.memory_space<vmem>>, vector<4x1x1xf32>
    %cst = arith.constant dense<0.000000e+00> : vector<4x1xf32>
    %9 = vector.multi_reduction <add>, %7, %cst [2] : vector<4x1x8xf32> to vector<4x1xf32>
    %10 = vector.shape_cast %9 : vector<4x1xf32> to vector<4x1x1xf32>
    %11 = arith.addf %8, %10 : vector<4x1x1xf32>
    %c0_6 = arith.constant 0 : index
    %c0_7 = arith.constant 0 : index
    %c0_8 = arith.constant 0 : index
    %12 = vector.load %arg6[%c0_6, %c0_7, %c0_8] : memref<4x1x1xf32, #tpu.memory_space<vmem>>, vector<4x1x1xf32>
    tpu.vector_store %arg6[%c0_6, %c0_7, %c0_8], %11 {strides = array<i32>} : memref<4x1x1xf32, #tpu.memory_space<vmem>>, vector<4x1x1xf32>,
    %13 = arith.truncf %7 : vector<4x1x8xf32> to vector<4x1x8xbf16>
    %c0_9 = arith.constant 0 : index
    %c0_10 = arith.constant 0 : index
    %c0_11 = arith.constant 0 : index
    %14 = vector.load %arg4[%c0_9, %c0_10, %c0_11] : memref<4x8x32xbf16, #tpu.memory_space<vmem>>, vector<4x8x32xbf16>
    %cst_12 = arith.constant dense<0.000000e+00> : vector<4x1x32xf32>
    %15 = tpu.matmul %13, %14, %cst_12 {dimension_numbers = #tpu.dot_dimension_numbers<[2], [1], [1], [2], [0, 0, 0, 1, 1, 2], [0], [0]>} : vector<4x1x8xbf16>, vector<4x8x32xbf16>, vector<4x1x32xf32> -> vector<4x1x32xf32>
    %c0_13 = arith.constant 0 : index
    %c0_14 = arith.constant 0 : index
    %c0_15 = arith.constant 0 : index
    %16 = vector.load %arg5[%c0_13, %c0_14, %c0_15] : memref<4x1x32xf32, #tpu.memory_space<vmem>>, vector<4x1x32xf32>
    %17 = arith.addf %16, %15 : vector<4x1x32xf32>
    %c0_16 = arith.constant 0 : index
    %c0_17 = arith.constant 0 : index
    %c0_18 = arith.constant 0 : index
    %18 = vector.load %arg5[%c0_16, %c0_17, %c0_18] : memref<4x1x32xf32, #tpu.memory_space<vmem>>, vector<4x1x32xf32>
    tpu.vector_store %arg5[%c0_16, %c0_17, %c0_18], %17 {strides = array<i32>} : memref<4x1x32xf32, #tpu.memory_space<vmem>>, vector<4x1x32xf32>,
    %c0_i32_19 = arith.constant 0 : i32
    %19 = arith.cmpi eq, %arg2, %c0_i32_19 : i32
    %20 = arith.extui %19 : i1 to i32
    %c0_i32_20 = arith.constant 0 : i32
    %21 = arith.cmpi ne, %20, %c0_i32_20 : i32
    scf.if %21 {
      %c0_21 = arith.constant 0 : index
      %c0_22 = arith.constant 0 : index
      %c0_23 = arith.constant 0 : index
      %22 = vector.load %arg5[%c0_21, %c0_22, %c0_23] : memref<4x1x32xf32, #tpu.memory_space<vmem>>, vector<4x1x32xf32>
      %c0_24 = arith.constant 0 : index
      %c0_25 = arith.constant 0 : index
      %c0_26 = arith.constant 0 : index
      %23 = vector.load %arg6[%c0_24, %c0_25, %c0_26] : memref<4x1x1xf32, #tpu.memory_space<vmem>>, vector<4x1x1xf32>
      %cst_27 = arith.constant 1.000000e+00 : f32
      %24 = vector.broadcast %cst_27 : f32 to vector<4x1x1xf32>
      %25 = arith.maximumf %23, %24 : vector<4x1x1xf32>
      %26 = vector.broadcast %25 : vector<4x1x1xf32> to vector<4x1x32xf32>
      %27 = arith.divf %22, %26 : vector<4x1x32xf32>
      %c0_28 = arith.constant 0 : index
      %c0_29 = arith.constant 0 : index
      %c0_30 = arith.constant 0 : index
      %28 = vector.load %arg5[%c0_28, %c0_29, %c0_30] : memref<4x1x32xf32, #tpu.memory_space<vmem>>, vector<4x1x32xf32>
      tpu.vector_store %arg5[%c0_28, %c0_29, %c0_30], %27 {strides = array<i32>} : memref<4x1x32xf32, #tpu.memory_space<vmem>>, vector<4x1x32xf32>,
    } else {
    }
    return
  }
  func.func @transform_0(%arg0: i32, %arg1: i32, %arg2: i32) -> (i32, i32, i32) {
    %c0_i32 = arith.constant 0 : i32
    %c0_i32_0 = arith.constant 0 : i32
    return %arg0, %c0_i32, %arg2 : i32, i32, i32
  }
  func.func @transform_1(%arg0: i32, %arg1: i32, %arg2: i32) -> (i32, i32, i32) {
    %c0_i32 = arith.constant 0 : i32
    return %arg0, %arg2, %arg1 : i32, i32, i32
  }
  func.func @transform_2(%arg0: i32, %arg1: i32, %arg2: i32) -> (i32, i32, i32) {
    %c0_i32 = arith.constant 0 : i32
    %c0_i32_0 = arith.constant 0 : i32
    return %arg0, %c0_i32, %arg1 : i32, i32, i32
  }
}

</mosaic_0001>

<bundles_post_ra>
// kernel: tpu_custom_call.1
= control target key start
LH: loop header
LB: loop body
LE: loop exit
PB: predicated region body
PF: predicated region fallthrough
CT: control target
= control target key end

     0   :  { %7 = vsyncpa [#allocation4], 0  ;;  %s640_s0 = inlined_call_operand.hbm [shape: s32[4,1,8], index: 0, kind: input, shape index: {}]   ;;  %s641_s1 = inlined_call_operand.hbm [shape: bf16[4,8,32], index: 1, kind: input, shape index: {}]   ;;  %s642_s2 = inlined_call_operand.hbm [shape: f32[4,1,32], index: 2, kind: output, shape index: {}]  }
   0x1   :  { %8 = vsyncpa [#allocation7], 0 }
   0x2   :  { %9 = vsyncpa [#allocation5], 0  ;;  %s517_s9 = smov [#allocation3]   ;;  %s445_s13 = scalar_lea.hbm %s640_s0, 64 }
   0x3   :  { %s15_s10 = sshll.u32 %s517_s9, 4  ;;  %p446_p0 = scmp.ne.s32.totalorder %s640_s0, %s445_s13  ;;  %s16_s10 = int_to_ptr.vmem [resolvable:$true] %s15_s10 }
   0x4   :  { %p449_p1 = scmp.lt.u32.totalorder %s445_s13, %s640_s0 }
   0x6   :  { %p451_p2 = pnand %p449_p1, %p446_p0 }
   0x8   :  { %454 = shalt.err (!%p451_p2)
}
   0x9   :  { %s455_s18 = scalar_lea.vmem %s16_s10, 64  ;;  %p460_p4 = scmp.lt.s32.totalorder %s16_s10, %s16_s10 }
   0xa   :  { %p456_p3 = scmp.ne.s32.totalorder %s16_s10, %s455_s18  ;;  %p461_p5 = scmp.lt.s32.totalorder %s455_s18, %s455_s18 }
   0xc   :  { %p462_p6 = por %p461_p5, %p460_p4 }
   0xe   :  { %p463_p7 = pnand %p462_p6, %p456_p3 }
  0x10   :  { %466 = shalt.err (!%p463_p7)
}
  0x11   :  { %s518_s19 = smov 16   ;;  %s519_s20 = smov 1  }
  0x12   :  { %21 = dma.hbm_to_vmem [thread:$0]  %s640_s0, 64, %s16_s10, [#allocation4], %s518_s19, %s518_s19, %s519_s20  }
  0x13   :  { %s520_s23 = smov [#allocation6]   ;;  %s467_s27 = scalar_lea.hbm %s641_s1, 256 }
  0x14   :  { %s27_s24 = sshll.u32 %s520_s23, 4  ;;  %p468_p8 = scmp.ne.s32.totalorder %s641_s1, %s467_s27  ;;  %s28_s24 = int_to_ptr.vmem [resolvable:$true] %s27_s24 }
  0x15   :  { %p471_p9 = scmp.lt.u32.totalorder %s467_s27, %s641_s1 }
  0x17   :  { %p473_p10 = pnand %p471_p9, %p468_p8 }
  0x19   :  { %476 = shalt.err (!%p473_p10)
}
  0x1a   :  { %s477_s4 = scalar_lea.vmem %s28_s24, 256  ;;  %p482_p12 = scmp.lt.s32.totalorder %s28_s24, %s28_s24 }
  0x1b   :  { %p478_p11 = scmp.ne.s32.totalorder %s28_s24, %s477_s4  ;;  %p483_p13 = scmp.lt.s32.totalorder %s477_s4, %s477_s4 }
  0x1d   :  { %p484_p0 = por %p483_p13, %p482_p12 }
  0x1f   :  { %p485_p1 = pnand %p484_p0, %p478_p11 }
  0x21   :  { %488 = shalt.err (!%p485_p1)
}
  0x22   :  { %s521_s0 = smov 64   ;;  %s522_s5 = smov 4  }
  0x23   :  { %33 = dma.hbm_to_vmem [thread:$0]  %s641_s1, 256, %s28_s24, [#allocation7], %s521_s0, %s521_s0, %s522_s5  }
  0x24   :  { %511 = dma.done.wait [#allocation4], 64  }
  0x25   :  { %512 = vsyncadd [#allocation4], 4294967232 }
  0x26   :  { %513 = dma.done.wait [#allocation7], 256  }
  0x27   :  { %514 = vsyncadd [#allocation7], 4294967040  ;;  %v523_v0 = vmov 0.0   ;;  %vm50_vm0 = vcmask 0   ;;  %vm524_vm1 = vmmov 0   ;;  %vm75_vm2 = vcmask 57344  }
  0x28   :  { %401 = vmatprep.subr.bf16.mxu0 %v523_v0  ;;  %407 = vmatprep.subr.bf16.mxu1 %v523_v0  ;;  %51 = vst.msk [vmem:[#allocation2] sm:$0x1] %vm50_vm0, %v523_v0  ;;  %52 = vst.msk [vmem:[#allocation2 + $0x1] sm:$0x1] %vm50_vm0, %v523_v0  ;;  %v55_v1 = vld [vmem:[#allocation3] sm:$0x1] }
  0x29   :  { %403 = vmatprep.mubr.msk.bf16.mxu0 %vm524_vm1, %v523_v0  ;;  %409 = vmatprep.mubr.msk.bf16.mxu1 %vm524_vm1, %v523_v0  ;;  %53 = vst.msk [vmem:[#allocation2 + $0x2] sm:$0x1] %vm50_vm0, %v523_v0  ;;  %54 = vst.msk [vmem:[#allocation2 + $0x3] sm:$0x1] %vm50_vm0, %v523_v0  ;;  %v56_v2 = vld [vmem:[#allocation3 + $0x1] sm:$0x1] }
  0x2a   :  { %v57_v3 = vld [vmem:[#allocation3 + $0x2] sm:$0x1]  ;;  %vm59_vm3 = vcmp.ne.s32.totalorder %v55_v1, 1  ;;  %vm60_vm4 = vcmp.ne.s32.totalorder %v56_v2, 1  ;;  %v58_v4 = vld [vmem:[#allocation3 + $0x3] sm:$0x1] }
  0x2b   :  { %vm61_vm5 = vcmp.ne.s32.totalorder %v57_v3, 1  ;;  %vm109_vm6 = vcmask 1043456   ;;  %v385_v5 = vsel %vm59_vm3, 1.0, %v523_v0  ;;  %v386_v6 = vsel %vm60_vm4, 1.0, %v523_v0  ;;  %v101_v8 = vld [vmem:[#allocation6] sm:$0xf] }
  0x2c   :  { %v387_v7 = vsel %vm61_vm5, 1.0, %v523_v0  ;;  %vm62_vm7 = vcmp.ne.s32.totalorder %v58_v4, 1  ;;  %v76_v9 = vsel %vm75_vm2, %v385_v5, 0.0  ;;  %v102_v10 = vld [vmem:[#allocation6 + $0x4] sm:$0xf]  ;;  %v97_v12 = vpack.c.bf16 %v385_v5, %v385_v5  ;;  %s526_s1 = smov [#allocation8]  }
  0x2d   :  { %v103_v11 = vld [vmem:[#allocation6 + $0x8] sm:$0xf]  ;;  %77 = vadd.xlane.f32.xlu0 %v76_v9  ;;  %v82_v13 = vsel %vm75_vm2, %v387_v7, 0.0  ;;  %v388_v14 = vsel %vm62_vm7, 1.0, %v523_v0  ;;  %v111_v15 = vsel %vm109_vm6, %v101_v8, 0  ;;  %v79_v17 = vsel %vm75_vm2, %v386_v6, 0.0 }
  0x2e   :  { %v104_v16 = vld [vmem:[#allocation6 + $0xc] sm:$0xf]  ;;  %v98_v18 = vpack.c.bf16 %v386_v6, %v386_v6  ;;  %83 = vadd.xlane.f32.xlu1 %v82_v13  ;;  %402 = vmatpush3.bf16.msra.mxu0 %v111_v15  ;;  %v157_v19 = vsel %vm109_vm6, %v102_v10, 0  ;;  %vm105_vm8 = vcmask 64512   ;;  %v85_v20 = vsel %vm75_vm2, %v388_v14, 0.0  ;;  %s372_s8 = sshll.u32 %s526_s1, 4  ;;  %s373_s8 = int_to_ptr.vmem [resolvable:$true] %s372_s8 }
  0x2f   :  { %408 = vmatpush3.bf16.msra.mxu1 %v157_v19  ;;  %413 = vmatprep.subr.bf16.mxu0 %v523_v0  ;;  %v203_v21 = vsel %vm109_vm6, %v103_v11, 0  ;;  %v249_v22 = vsel %vm109_vm6, %v104_v16, 0  ;;  %v99_v23 = vpack.c.bf16 %v387_v7, %v387_v7  ;;  %v100_v24 = vpack.c.bf16 %v388_v14, %v388_v14  ;;  %v71_v26 = vld [vmem:[#allocation2] sm:$0x1]  ;;  %v72_v31 = vld [vmem:[#allocation2 + $0x1] sm:$0x1]  ;;  %p494_p3 = scmp.lt.s32.totalorder %s373_s8, %s373_s8 }
  0x30   :  { %419 = vmatprep.subr.bf16.mxu1 %v523_v0  ;;  %v525_v25 = vmov 0   ;;  %v73_v27 = vld [vmem:[#allocation2 + $0x2] sm:$0x1]  ;;  %v74_v33 = vld [vmem:[#allocation2 + $0x3] sm:$0x1]  ;;  %vm45_vm9 = vcmask 253952   ;;  %v324_v6 = vlaneseq }
  0x31   :  { %80 = vadd.xlane.f32.xlu0 %v79_v17  ;;  %404 = vmatmul.mubr.msk.bf16.vlgmr.msra.gmra.mrb[0].mxu0 %vm105_vm8, %v97_v12  ;;  %46 = vst.msk [vmem:[#allocation8] sm:$0x1] %vm45_vm9, %v523_v0  ;;  %47 = vst.msk [vmem:[#allocation8 + $0x1] sm:$0x1] %vm45_vm9, %v523_v0  ;;  %s489_s9 = scalar_lea.vmem %s373_s8, 64 }
  0x32   :  { %86 = vadd.xlane.f32.xlu1 %v85_v20  ;;  %410 = vmatmul.mubr.msk.bf16.vlgmr.msra.gmra.mrb[0].mxu1 %vm105_vm8, %v98_v18  ;;  %48 = vst.msk [vmem:[#allocation8 + $0x2] sm:$0x1] %vm45_vm9, %v523_v0  ;;  %49 = vst.msk [vmem:[#allocation8 + $0x3] sm:$0x1] %vm45_vm9, %v523_v0  ;;  %v325_v7 = vshrl.u32 %v324_v6, 7  ;;  %p490_p2 = scmp.ne.s32.totalorder %s373_s8, %s489_s9  ;;  %p495_p4 = scmp.lt.s32.totalorder %s489_s9, %s489_s9 }
  0x33   :  { %414 = vmatpush3.bf16.msra.mxu0 %v203_v21  ;;  %420 = vmatpush3.bf16.msra.mxu1 %v249_v22 }
  0x34   :  { %415 = vmatprep.mubr.msk.bf16.mxu0 %vm524_vm1, %v523_v0  ;;  %421 = vmatprep.mubr.msk.bf16.mxu1 %vm524_vm1, %v523_v0  ;;  %v326_v8 = vsub.s32 0, %v325_v7  ;;  %p496_p5 = por %p495_p4, %p494_p3 }
  0x35   :  { %435 = vset.pattern.permute.xlu0 %v525_v25  ;;  %436 = vset.pattern.permute.xlu1 %v525_v25 }
  0x36   :  { %p497_p6 = pnand %p496_p5, %p490_p2 }
  0x38   :  { %v291_v46 = vld [vmem:[#allocation8] sm:$0x1]  ;;  %v292_v47 = vld [vmem:[#allocation8 + $0x1] sm:$0x1] }
  0x39   :  { %416 = vmatmul.mubr.msk.bf16.vlgmr.msra.gmra.mrb[4].mxu0 %vm105_vm8, %v99_v23  ;;  %v293_v58 = vld [vmem:[#allocation8 + $0x2] sm:$0x1]  ;;  %v294_v59 = vld [vmem:[#allocation8 + $0x3] sm:$0x1] }
  0x3a   :  { %422 = vmatmul.mubr.msk.bf16.vlgmr.msra.gmra.mrb[4].mxu1 %vm105_vm8, %v100_v24 }
  0xba   :  { %v78_v28 = vpop.xlane.xlu0 %77 }
  0xbb   :  { %v88_v29 = vadd.f32 %v78_v28, %v71_v26  ;;  %v84_v30 = vpop.xlane.xlu1 %83 }
  0xbc   :  { %v90_v32 = vadd.f32 %v84_v30, %v73_v27 }
  0xbd   :  { %93 = vst.msk [vmem:[#allocation2] sm:$0x1] %vm50_vm0, %v88_v29 }
  0xbe   :  { %v81_v34 = vpop.xlane.xlu0 %80  ;;  %95 = vst.msk [vmem:[#allocation2 + $0x2] sm:$0x1] %vm50_vm0, %v90_v32 }
  0xbf   :  { %v89_v35 = vadd.f32 %v81_v34, %v72_v31  ;;  %v87_v36 = vpop.xlane.xlu1 %86 }
  0xc0   :  { %v91_v37 = vadd.f32 %v87_v36, %v74_v33 }
  0xc1   :  { %94 = vst.msk [vmem:[#allocation2 + $0x1] sm:$0x1] %vm50_vm0, %v89_v35 }
  0xc2   :  { %96 = vst.msk [vmem:[#allocation2 + $0x3] sm:$0x1] %vm50_vm0, %v91_v37 }
  0xc4   :  { %v311_v38 = vld [vmem:[#allocation2] sm:$0x1] }
  0xc5   :  { %v315_v39 = vmax.f32 %v311_v38, 1.0  ;;  %v313_v41 = vld [vmem:[#allocation2 + $0x2] sm:$0x1] }
  0xc6   :  { %v317_v43 = vmax.f32 %v313_v41, 1.0 }
  0xc7   :  { %321 = vperm.xlu0 %435, %v315_v39  }
  0xc8   :  { %v312_v40 = vld [vmem:[#allocation2 + $0x1] sm:$0x1] }
  0xc9   :  { %v316_v42 = vmax.f32 %v312_v40, 1.0  ;;  %v314_v44 = vld [vmem:[#allocation2 + $0x3] sm:$0x1] }
  0xca   :  { %v318_v45 = vmax.f32 %v314_v44, 1.0 }
  0xcb   :  { %330 = vperm.xlu1 %436, %v316_v42  }
  0xcf   :  { %339 = vperm.xlu1 %436, %v317_v43  }
  0xd3   :  { %348 = vperm.xlu1 %436, %v318_v45  }
 0x104   :  { %v147_v48 = vpop.f32.mrb[0].mxu0 }
 0x105   :  { %v295_v49 = vadd.f32 %v291_v46, %v147_v48  ;;  %v193_v50 = vpop.f32.mrb[0].mxu1  ;;  %v405_v51 = vpop.f32.mrb[1].mxu0 }
 0x106   :  { %v296_v52 = vadd.f32 %v292_v47, %v193_v50  ;;  %v411_v53 = vpop.f32.mrb[1].mxu1  ;;  %v150_v54 = vpop.f32.mrb[2].mxu0 }
 0x107   :  { %300 = vst.msk [vmem:[#allocation8] sm:$0x1] %vm45_vm9, %v295_v49  ;;  %v196_v55 = vpop.f32.mrb[2].mxu1  ;;  %v406_v56 = vpop.f32.mrb[3].mxu0 }
 0x108   :  { %301 = vst.msk [vmem:[#allocation8 + $0x1] sm:$0x1] %vm45_vm9, %v296_v52  ;;  %v412_v57 = vpop.f32.mrb[3].mxu1 }
 0x10c   :  { %v239_v60 = vpop.f32.mrb[4].mxu0 }
 0x10d   :  { %v297_v61 = vadd.f32 %v293_v58, %v239_v60  ;;  %v285_v62 = vpop.f32.mrb[4].mxu1  ;;  %v417_v63 = vpop.f32.mrb[5].mxu0 }
 0x10e   :  { %v298_v0 = vadd.f32 %v294_v59, %v285_v62  ;;  %v423_v1 = vpop.f32.mrb[5].mxu1  ;;  %v242_v2 = vpop.f32.mrb[6].mxu0  ;;  %v307_v15 = vld [vmem:[#allocation8] sm:$0x1] }
 0x10f   :  { %302 = vst.msk [vmem:[#allocation8 + $0x2] sm:$0x1] %vm45_vm9, %v297_v61  ;;  %v288_v3 = vpop.f32.mrb[6].mxu1  ;;  %v418_v4 = vpop.f32.mrb[7].mxu0  ;;  %v308_v20 = vld [vmem:[#allocation8 + $0x1] sm:$0x1] }
 0x110   :  { %303 = vst.msk [vmem:[#allocation8 + $0x3] sm:$0x1] %vm45_vm9, %v298_v0  ;;  %v424_v5 = vpop.f32.mrb[7].mxu1 }
 0x116   :  { %v309_v23 = vld [vmem:[#allocation8 + $0x2] sm:$0x1] }
 0x117   :  { %v310_v26 = vld [vmem:[#allocation8 + $0x3] sm:$0x1] }
 0x146   :  { %v322_v9 = vpop.permute.xlu0 %321 }
 0x147   :  { %v327_v10 = vrot.slane %v322_v9, %v326_v8 }
 0x149   :  { %437 = vrcp.f32 %v327_v10 }
 0x14a   :  { %v331_v11 = vpop.permute.xlu1 %330 }
 0x14b   :  { %v336_v12 = vrot.slane %v331_v11, %v326_v8 }
 0x14d   :  { %439 = vrcp.f32 %v336_v12 }
 0x14e   :  { %v340_v13 = vpop.permute.xlu1 %339 }
 0x14f   :  { %v345_v14 = vrot.slane %v340_v13, %v326_v8 }
 0x151   :  { %441 = vrcp.f32 %v345_v14 }
 0x152   :  { %v349_v16 = vpop.permute.xlu1 %348 }
 0x153   :  { %v438_v17 = vpop.eup %437  ;;  %v354_v18 = vrot.slane %v349_v16, %v326_v8 }
 0x154   :  { %v356_v19 = vmul.f32 %v438_v17, %v307_v15 }
 0x155   :  { %443 = vrcp.f32 %v354_v18 }
 0x156   :  { %363 = vst.msk [vmem:[#allocation8] sm:$0x1] %vm45_vm9, %v356_v19 }
 0x157   :  { %v440_v21 = vpop.eup %439 }
 0x158   :  { %v358_v22 = vmul.f32 %v440_v21, %v308_v20 }
 0x15a   :  { %364 = vst.msk [vmem:[#allocation8 + $0x1] sm:$0x1] %vm45_vm9, %v358_v22 }
 0x15b   :  { %v442_v24 = vpop.eup %441 }
 0x15c   :  { %v360_v25 = vmul.f32 %v442_v24, %v309_v23 }
 0x15e   :  { %365 = vst.msk [vmem:[#allocation8 + $0x2] sm:$0x1] %vm45_vm9, %v360_v25 }
 0x15f   :  { %v444_v27 = vpop.eup %443 }
 0x160   :  { %v362_v28 = vmul.f32 %v444_v27, %v310_v26 }
 0x162   :  { %366 = vst.msk [vmem:[#allocation8 + $0x3] sm:$0x1] %vm45_vm9, %v362_v28 }
 0x163   :  { %500 = shalt.err (!%p497_p6)
}
 0x164   :  { %s501_s12 = scalar_lea.hbm %s642_s2, 64 }
 0x165   :  { %p502_p7 = scmp.ne.s32.totalorder %s642_s2, %s501_s12  ;;  %p505_p8 = scmp.lt.u32.totalorder %s501_s12, %s642_s2 }
 0x167   :  { %p507_p9 = pnand %p505_p8, %p502_p7 }
 0x169   :  { %510 = shalt.err (!%p507_p9)
}
 0x16a   :  { %378 = dma.vmem_to_hbm [thread:$0]  %s373_s8, 64, %s642_s2, [#allocation5], %s518_s19, %s518_s19, %s519_s20  }
 0x16b   :  { %515 = dma.done.wait [#allocation5], 64  }
 0x16c   :  { %516 = vsyncadd [#allocation5], 4294967232 }
 0x16d   :  { %382 = vsyncpa [#allocation4], 1 }
 0x16e   :  { %383 = vsyncpa [#allocation7], 1 }
 0x16f   :  { %384 = vsyncpa [#allocation5], 1 }

</bundles_post_ra>
